<compile_context>
chip_gen: v7x
topology: tpu7x:2x2x1
jax: 0.10.0
libtpu: 0.0.40
codegen_flags: <defaults>
</compile_context>

<pallas_src>
import functools

import jax
import jax.numpy as jnp
from jax.experimental import pallas as pl
from jax.experimental.pallas import tpu as pltpu


def _round_up(x, m):
    return ((x + m - 1) // m) * m


def _gat_kernel(x_ref, w_ref, g_ref, b_ref, o_ref, *, n_nodes, n_valid,
                matmul_dtype):
    # x_ref: (bt*Np, Cp)  w_ref: (Cp, Dp)  g_ref: (Np, Np)  b_ref: (1, Dp)
    # o_ref: (bt, Np, Dp)
    Np = n_nodes
    bt = x_ref.shape[0] // Np
    Dp = w_ref.shape[1]

    g = g_ref[...]                    # (Np, Np)
    bias = b_ref[...]                 # (1, Dp)

    # h = W(inputs): one fused MXU matmul for the whole batch block.
    h2 = jnp.dot(x_ref[...], w_ref[...], preferred_element_type=jnp.float32)
    h = h2.reshape(bt, Np, Dp)        # layout-trivial split (Np multiple of 8)
    hm = h.astype(matmul_dtype)

    # scores = (h @ h^T) * graph  -- batched contraction on the last dims
    # (no explicit transpose materialized), f32 accumulation.
    s = jnp.einsum("bnd,bmd->bnm", hm, hm,
                   preferred_element_type=jnp.float32)          # (bt, Np, Np)
    s = s * g                                                   # graph bcast over batch
    # masked_fill(scores == 0, -1e16): exact PyTorch float-equality semantics.
    s = jnp.where(s == 0.0, jnp.float32(-1e16), s)
    if n_valid < Np:
        # Padded key columns must never contribute (even in the degenerate
        # all-masked-row case) -> force them to -inf, exp() gives exact 0.
        col = jax.lax.broadcasted_iota(jnp.int32, (1, 1, Np), 2)
        s = jnp.where(col >= n_valid, jnp.float32(-jnp.inf), s)

    # Online-style softmax statistics in f32.
    m = jnp.max(s, axis=-1, keepdims=True)
    e = jnp.exp(s - m)
    denom = jnp.sum(e, axis=-1, keepdims=True)

    # Deferred normalization: matmul with the un-normalized probabilities and
    # scale the (bt, Np, Dp) result instead of the (bt, Np, Np) matrix.
    out = jnp.einsum("bnm,bmd->bnd", e.astype(matmul_dtype), hm,
                     preferred_element_type=jnp.float32)        # (bt, Np, Dp)

    r = pl.reciprocal(denom, approx=True)        # EUP vrcp (free slot)
    r = r * (2.0 - denom * r)                    # one Newton step -> f32 parity

    o_ref[...] = (out * r + bias).astype(o_ref.dtype)


def _invariant_spec(shape):
    """BlockSpec for a grid-invariant operand, single-buffered when supported."""
    index_map = lambda i, _n=len(shape): (0,) * _n
    try:
        return pl.BlockSpec(shape, index_map, pipeline_mode=pl.Buffered(1))
    except (TypeError, AttributeError):
        return pl.BlockSpec(shape, index_map)


def graph_attention_layer(inputs, graph, W, b, *, block_b=None,
                          matmul_dtype=jnp.float32):
    """inputs [B,N,C] f32, graph [N,N] f32, W [C,D] f32, b [D] f32 -> [B,N,D] f32."""
    B, N, C = inputs.shape
    D = W.shape[1]

    # Lane/sublane-friendly padding (all zeros -> results unchanged).
    Np = _round_up(N, 8)
    Cp = _round_up(C, 128)
    Dp = _round_up(D, 128)

    x_p = (jnp.pad(inputs, ((0, 0), (0, Np - N), (0, Cp - C)))
           if (Np != N or Cp != C) else inputs)
    g_p = jnp.pad(graph, ((0, Np - N), (0, Np - N))) if Np != N else graph
    W_p = (jnp.pad(W, ((0, Cp - C), (0, Dp - D)))
           if (Cp != C or Dp != D) else W)
    b_p = (jnp.pad(b, (0, Dp - D)) if Dp != D else b).reshape(1, Dp)

    # VMEM sizing: ~0.8x the actual per-core capacity (64 MiB conservative
    # fallback works on every generation, including v7x).
    try:
        vmem_cap = int(pltpu.get_tpu_info().vmem_capacity_bytes)
    except Exception:
        vmem_cap = 64 * 1024 * 1024
    vmem_limit = int(vmem_cap * 0.8)
    budget = int(vmem_limit * 0.75)            # headroom for compiler temporaries

    mm_bytes = jnp.dtype(matmul_dtype).itemsize
    per_batch = (
        2 * Np * Cp * 4            # x block (double-buffered)
        + 2 * Np * Dp * 4          # output block (double-buffered)
        + 2 * Np * Dp * 4          # h + attn@h result temporaries (f32)
        + Np * Dp * mm_bytes       # hm cast
        + 2 * Np * Np * 4          # scores / exp temporaries (f32)
        + Np * Np * mm_bytes       # e cast fed to the second matmul
    )
    shared = Cp * Dp * 4 + Np * Np * 4 + Dp * 4   # single-buffered W / graph / bias

    if block_b is None:
        block_b = max(1, (budget - shared) // max(per_batch, 1))
        block_b = min(block_b, B)
        if B >= 2:
            # >=2 grid steps so both v7x TensorCores get work (no-op on v5e/v6e).
            block_b = min(block_b, B // 2)
        block_b = max(1, block_b)
        # Pick a divisor of B, preferring bt*Np aligned to the 256-wide MXU M dim.
        divisors = [d for d in range(1, block_b + 1) if B % d == 0]
        aligned = [d for d in divisors if (d * Np) % 256 == 0]
        block_b = max(aligned) if aligned else max(divisors)
    bt = block_b
    assert B % bt == 0, "block_b must divide B"

    x2 = x_p.reshape(B * Np, Cp)      # flatten batch in the wrapper (free)

    kernel = functools.partial(_gat_kernel, n_nodes=Np, n_valid=N,
                               matmul_dtype=matmul_dtype)

    out_p = pl.pallas_call(
        kernel,
        out_shape=jax.ShapeDtypeStruct((B, Np, Dp), jnp.float32),
        grid_spec=pltpu.PrefetchScalarGridSpec(
            num_scalar_prefetch=0,
            grid=(B // bt,),
            in_specs=[
                pl.BlockSpec((bt * Np, Cp), lambda i: (i, 0)),   # features (flattened)
                _invariant_spec((Cp, Dp)),                       # weight (shared)
                _invariant_spec((Np, Np)),                       # graph (shared)
                _invariant_spec((1, Dp)),                        # bias (shared)
            ],
            out_specs=pl.BlockSpec((bt, Np, Dp), lambda i: (i, 0, 0)),
        ),
        compiler_params=pltpu.CompilerParams(
            dimension_semantics=("parallel",),
            vmem_limit_bytes=vmem_limit,
        ),
    )(x2, W_p, g_p, b_p)

    if Np != N or Dp != D:
        out_p = out_p[:, :N, :D]
    return out_p


def reference(inputs, graph, W, b):
    h = jnp.einsum("bnc,cd->bnd", inputs, W)
    s = jnp.einsum("bnd,bmd->bnm", h, h) * graph[None]
    s = jnp.where(s == 0.0, -1e16, s)
    attn = jax.nn.softmax(s, axis=2)
    return jnp.einsum("bnm,bmd->bnd", attn, h) + b


if __name__ == "__main__":
    B, N, C, D = 2, 16, 4, 32

    key = jax.random.PRNGKey(0)
    k_x, k_w, k_b, k_g = jax.random.split(key, 4)

    # Deterministic synthetic parameters (nn.init.normal_ equivalents).
    W = jax.random.normal(k_w, (C, D), dtype=jnp.float32)   # W.weight.T
    b = jax.random.normal(k_b, (D,), dtype=jnp.float32)

    # Inputs and a binary adjacency graph.
    x = jax.random.normal(k_x, (B, N, C), dtype=jnp.float32)
    graph = (jax.random.uniform(k_g, (N, N)) > 0.5).astype(jnp.float32)

    out = graph_attention_layer(x, graph, W, b)
    out = jax.block_until_ready(out)

    ref = reference(x, graph, W, b)
    assert out.shape == (B, N, D)
    assert jnp.allclose(out, ref, atol=2e-3, rtol=2e-3), "mismatch vs reference"

    print("KERNEL_OK")
</pallas_src>

<mosaic_0001>
module attributes {stable_mosaic.version = 11 : i64} {
  func.func @_gat_kernel(%arg0: i32, %arg1: memref<16x128xf32, #tpu.memory_space<vmem>>, %arg2: memref<128x128xf32, #tpu.memory_space<vmem>>, %arg3: memref<16x16xf32, #tpu.memory_space<vmem>>, %arg4: memref<1x128xf32, #tpu.memory_space<vmem>>, %arg5: memref<1x16x128xf32, #tpu.memory_space<vmem>>) attributes {dimension_semantics = [#tpu.dimension_semantics<parallel>], iteration_bounds = array<i64: 2>, scalar_prefetch = 0 : i64, scratch_operands = 0 : i64, tpu.core_type = #tpu.core_type<tc>, window_params = [{transform_indices = @transform_0, window_bounds = array<i64: 16, 128>}, {pipeline_mode = #tpu.pipeline_mode<synchronous>, transform_indices = @transform_1, window_bounds = array<i64: 128, 128>}, {pipeline_mode = #tpu.pipeline_mode<synchronous>, transform_indices = @transform_2, window_bounds = array<i64: 16, 16>}, {pipeline_mode = #tpu.pipeline_mode<synchronous>, transform_indices = @transform_3, window_bounds = array<i64: 1, 128>}, {transform_indices = @transform_4, window_bounds = array<i64: 1, 16, 128>}]} {
    %c0 = arith.constant 0 : index
    %c0_0 = arith.constant 0 : index
    %0 = vector.load %arg3[%c0, %c0_0] : memref<16x16xf32, #tpu.memory_space<vmem>>, vector<16x16xf32>
    %c0_1 = arith.constant 0 : index
    %c0_2 = arith.constant 0 : index
    %1 = vector.load %arg4[%c0_1, %c0_2] : memref<1x128xf32, #tpu.memory_space<vmem>>, vector<1x128xf32>
    %c0_3 = arith.constant 0 : index
    %c0_4 = arith.constant 0 : index
    %2 = vector.load %arg1[%c0_3, %c0_4] : memref<16x128xf32, #tpu.memory_space<vmem>>, vector<16x128xf32>
    %c0_5 = arith.constant 0 : index
    %c0_6 = arith.constant 0 : index
    %3 = vector.load %arg2[%c0_5, %c0_6] : memref<128x128xf32, #tpu.memory_space<vmem>>, vector<128x128xf32>
    %cst = arith.constant dense<0.000000e+00> : vector<16x128xf32>
    %4 = tpu.matmul %2, %3, %cst {dimension_numbers = #tpu.dot_dimension_numbers<[1], [0], [0], [1], [0, 0, 1, 1], [], []>} : vector<16x128xf32>, vector<128x128xf32>, vector<16x128xf32> -> vector<16x128xf32>
    %5 = vector.shape_cast %4 : vector<16x128xf32> to vector<1x16x128xf32>
    "tpu.trace_start"() <{level = 10 : i32, message = "bnd,bmd->bnm"}> : () -> ()
    %cst_7 = arith.constant dense<0.000000e+00> : vector<1x16x16xf32>
    %6 = tpu.matmul %5, %5, %cst_7 {dimension_numbers = #tpu.dot_dimension_numbers<[2], [2], [1], [1], [0, 0, 0, 1, 1, 1], [0], [0]>} : vector<1x16x128xf32>, vector<1x16x128xf32>, vector<1x16x16xf32> -> vector<1x16x16xf32>
    "tpu.trace_stop"() : () -> ()
    %7 = vector.shape_cast %0 : vector<16x16xf32> to vector<1x16x16xf32>
    %8 = arith.mulf %6, %7 : vector<1x16x16xf32>
    %cst_8 = arith.constant 0.000000e+00 : f32
    %9 = vector.broadcast %cst_8 : f32 to vector<1x16x16xf32>
    %10 = arith.cmpf oeq, %8, %9 : vector<1x16x16xf32>
    %cst_9 = arith.constant -1.000000e+16 : f32
    %11 = vector.broadcast %cst_9 : f32 to vector<1x16x16xf32>
    %12 = arith.select %10, %11, %8 : vector<1x16x16xi1>, vector<1x16x16xf32>
    %cst_10 = arith.constant dense<0xFF800000> : vector<1x16xf32>
    %13 = vector.multi_reduction <maximumf>, %12, %cst_10 [2] : vector<1x16x16xf32> to vector<1x16xf32>
    %14 = vector.shape_cast %13 : vector<1x16xf32> to vector<1x16x1xf32>
    %15 = vector.broadcast %14 : vector<1x16x1xf32> to vector<1x16x16xf32>
    %16 = arith.subf %12, %15 : vector<1x16x16xf32>
    %17 = math.exp %16 : vector<1x16x16xf32>
    %cst_11 = arith.constant dense<0.000000e+00> : vector<1x16xf32>
    %18 = vector.multi_reduction <add>, %17, %cst_11 [2] : vector<1x16x16xf32> to vector<1x16xf32>
    %19 = vector.shape_cast %18 : vector<1x16xf32> to vector<1x16x1xf32>
    "tpu.trace_start"() <{level = 10 : i32, message = "bnm,bmd->bnd"}> : () -> ()
    %cst_12 = arith.constant dense<0.000000e+00> : vector<1x16x128xf32>
    %20 = tpu.matmul %17, %5, %cst_12 {dimension_numbers = #tpu.dot_dimension_numbers<[2], [1], [1], [2], [0, 0, 0, 1, 1, 2], [0], [0]>} : vector<1x16x16xf32>, vector<1x16x128xf32>, vector<1x16x128xf32> -> vector<1x16x128xf32>
    "tpu.trace_stop"() : () -> ()
    %21 = tpu.reciprocal %19 {approx = true} : vector<1x16x1xf32> -> vector<1x16x1xf32>
    %22 = arith.mulf %19, %21 : vector<1x16x1xf32>
    %cst_13 = arith.constant 2.000000e+00 : f32
    %23 = vector.broadcast %cst_13 : f32 to vector<1x16x1xf32>
    %24 = arith.subf %23, %22 : vector<1x16x1xf32>
    %25 = arith.mulf %21, %24 : vector<1x16x1xf32>
    %26 = vector.broadcast %25 : vector<1x16x1xf32> to vector<1x16x128xf32>
    %27 = arith.mulf %20, %26 : vector<1x16x128xf32>
    %28 = vector.shape_cast %1 : vector<1x128xf32> to vector<1x1x128xf32>
    %29 = vector.broadcast %28 : vector<1x1x128xf32> to vector<1x16x128xf32>
    %30 = arith.addf %27, %29 : vector<1x16x128xf32>
    %c0_14 = arith.constant 0 : index
    %c0_15 = arith.constant 0 : index
    %c0_16 = arith.constant 0 : index
    %31 = vector.load %arg5[%c0_14, %c0_15, %c0_16] : memref<1x16x128xf32, #tpu.memory_space<vmem>>, vector<1x16x128xf32>
    tpu.vector_store %arg5[%c0_14, %c0_15, %c0_16], %30 {strides = array<i32>} : memref<1x16x128xf32, #tpu.memory_space<vmem>>, vector<1x16x128xf32>,
    return
  }
  func.func @transform_0(%arg0: i32) -> (i32, i32) {
    %c0_i32 = arith.constant 0 : i32
    %c0_i32_0 = arith.constant 0 : i32
    return %arg0, %c0_i32 : i32, i32
  }
  func.func @transform_1(%arg0: i32) -> (i32, i32) {
    %c0_i32 = arith.constant 0 : i32
    %c0_i32_0 = arith.constant 0 : i32
    %c0_i32_1 = arith.constant 0 : i32
    return %c0_i32, %c0_i32_0 : i32, i32
  }
  func.func @transform_2(%arg0: i32) -> (i32, i32) {
    %c0_i32 = arith.constant 0 : i32
    %c0_i32_0 = arith.constant 0 : i32
    %c0_i32_1 = arith.constant 0 : i32
    return %c0_i32, %c0_i32_0 : i32, i32
  }
  func.func @transform_3(%arg0: i32) -> (i32, i32) {
    %c0_i32 = arith.constant 0 : i32
    %c0_i32_0 = arith.constant 0 : i32
    %c0_i32_1 = arith.constant 0 : i32
    return %c0_i32, %c0_i32_0 : i32, i32
  }
  func.func @transform_4(%arg0: i32) -> (i32, i32, i32) {
    %c0_i32 = arith.constant 0 : i32
    %c0_i32_0 = arith.constant 0 : i32
    %c0_i32_1 = arith.constant 0 : i32
    return %arg0, %c0_i32, %c0_i32_0 : i32, i32, i32
  }
}

</mosaic_0001>

<bundles_post_ra>
// kernel: tpu_custom_call.1
= control target key start
LH: loop header
LB: loop body
LE: loop exit
PB: predicated region body
PF: predicated region fallthrough
CT: control target
= control target key end

     0   :  { %9 = vsyncpa [#allocation3], 0  ;;  %s1317_s0 = inlined_call_operand.hbm [shape: f32[32,128], index: 0, kind: input, shape index: {}]   ;;  %s1318_s1 = inlined_call_operand.hbm [shape: f32[128,128], index: 1, kind: input, shape index: {}]   ;;  %s1319_s2 = inlined_call_operand.hbm [shape: f32[16,16], index: 2, kind: input, shape index: {}]   ;;  %s1320_s3 = inlined_call_operand.vmem [shape: f32[1,128], index: 3, kind: input, shape index: {}]   ;;  %s1321_s4 = inlined_call_operand.hbm [shape: f32[2,16,128], index: 4, kind: output, shape index: {}]  }
   0x1   :  { %11 = vsyncpa [#allocation3 + $0x1], 0 }
   0x2   :  { %12 = vsyncpa [#allocation6], 0 }
   0x3   :  { %13 = vsyncpa [#allocation4], 0 }
   0x4   :  { %15 = vsyncpa [#allocation4 + $0x1], 0  ;;  %s1057_s15 = smov 0   ;;  %s1059_s16 = smov 0  }
   0x5   :  { %s1061_s17 = smov 0   ;;  %s1063_s18 = smov 0  }
   0x6 LB: > { %s1078_s19 = sadd.s32 4294967295, %s1022_s18   ;;  %s649_s20 = sadd.s32 4294967294, %s1022_s18   ;;  %s1022_s18 = sphi %s1063_s18, %s1341_s18   ;;  %s1018_s17 = sphi %s1061_s17, %s1340_s17   ;;  %s1014_s16 = sphi %s1059_s16, %s1339_s16   ;;  %s1010_s15 = sphi %s1057_s15, %s1338_s15  }
   0x7   : > { %p41_p0 = scmp.ne.s32.totalorder %s1014_s16, %s1010_s15  ;;  %p1322_p1 = scmp.eq.s32.totalorder %s1078_s19, 0 }
   0x8   : > { %p134_p3 = scmp.eq.s32.totalorder %s649_s20, 1  ;;  %p650_p5 = scmp.ge.s32.totalorder %s1022_s18, 1 }
   0x9   : > { %p1087_p4 = por %p1322_p1, %p41_p0  ;;  %p141_p7 = scmp.lt.s32.totalorder %s1022_s18, 3 }
   0xa   : > { %p1092_p6 = por %p134_p3, %p41_p0  ;;  %s1024_s24 = smov [#allocation5]  }
   0xb   : > { %s1325_s21 = scalar_select %p1087_p4, 1, 0 }
   0xc   : > { %s1326_s22 = scalar_select %p1092_p6, 1, 0 }
   0xd   : > { %p1097_p8 = pnand %p650_p5, %p141_p7  ;;  %s153_s25 = sshll.u32 %s1024_s24, 4  ;;  %s1101_s25 = int_to_ptr.vmem [resolvable:$true] %s153_s25 }
   0xe   : > { %s1025_s27 = smov [#allocation7]   ;;  %s866_s5 = scalar_lea.hbm %s1318_s1, 2048 }
   0xf   : > { %p799_p9 = pneg %p1097_p8  ;;  %s166_s28 = sshll.u32 %s1025_s27, 4  ;;  %s1112_s28 = int_to_ptr.vmem [resolvable:$true] %s166_s28 }
  0x10   : > { %p867_p12 = scmp.ne.s32.totalorder %s1318_s1, %s866_s5  ;;  %p873_p5 = scmp.lt.u32.totalorder %s866_s5, %s1318_s1 }
  0x11   : > { %p1108_p11 = pnand %p799_p9, %p1322_p1 }
  0x13   : > { %p868_p13 = pneg %p1108_p11 }
  0x15   : > { %p869_p0 = pnand %p868_p13, %p867_p12 }
  0x17   : > { %p870_p3 = pneg %p869_p0 }
  0x19   : > { %p875_p7 = pnand %p873_p5, %p870_p3 }
  0x1b   : > { %878 = shalt.err (!%p875_p7)
}
  0x1c   : > { %s879_s10 = scalar_lea.vmem %s1101_s25, 2048  ;;  %p887_p2 = scmp.lt.s32.totalorder %s1101_s25, %s1101_s25 }
  0x1d   : > { %p880_p9 = scmp.ne.s32.totalorder %s1101_s25, %s879_s10  ;;  %p888_p12 = scmp.lt.s32.totalorder %s879_s10, %s879_s10 }
  0x1f   : > { %p882_p10 = pnand %p880_p9, %p868_p13  ;;  %p889_p0 = por %p888_p12, %p887_p2 }
  0x21   : > { %p883_p1 = pneg %p882_p10 }
  0x23   : > { %p890_p6 = pnand %p889_p0, %p883_p1 }
  0x25   : > { %893 = shalt.err (!%p890_p6)
}
  0x26   : > { %s1026_s11 = smov 128   ;;  %s1027_s12 = smov 8  }
  0x27   : > { %802 = dma.hbm_to_vmem [thread:$0]  (!%p1108_p11), %s1318_s1, 2048, %s1101_s25, [#allocation6], %s1026_s11, %s1026_s11, %s1027_s12  }
  0x28   : > { %s894_s27 = scalar_lea.hbm %s1319_s2, 256 }
  0x29   : > { %p895_p1 = scmp.ne.s32.totalorder %s1319_s2, %s894_s27  ;;  %p901_p10 = scmp.lt.u32.totalorder %s894_s27, %s1319_s2 }
  0x2b   : > { %p897_p2 = pnand %p895_p1, %p868_p13 }
  0x2d   : > { %p898_p6 = pneg %p897_p2 }
  0x2f   : > { %p903_p3 = pnand %p901_p10, %p898_p6 }
  0x31   : > { %906 = shalt.err (!%p903_p3)
}
  0x32   : > { %s907_s25 = scalar_lea.vmem %s1112_s28, 256  ;;  %p915_p12 = scmp.lt.s32.totalorder %s1112_s28, %s1112_s28 }
  0x33   : > { %p908_p5 = scmp.ne.s32.totalorder %s1112_s28, %s907_s25  ;;  %p916_p0 = scmp.lt.s32.totalorder %s907_s25, %s907_s25 }
  0x35   : > { %p910_p7 = pnand %p908_p5, %p868_p13  ;;  %p917_p1 = por %p916_p0, %p915_p12 }
  0x37   : > { %p911_p9 = pneg %p910_p7 }
  0x39   : > { %p918_p2 = pnand %p917_p1, %p911_p9 }
  0x3b   : > { %921 = shalt.err (!%p918_p2)
}
  0x3c   : > { %805 = dma.hbm_to_vmem [thread:$0]  (!%p1108_p11), %s1319_s2, 256, %s1112_s28, [#allocation6], %s1026_s11, %s1026_s11, %s1027_s12  }
  0x3d   : > { %s1173_s26 = sadd.s32 1, %s1022_s18   ;;  %s28_s9 = sadd.s32 1, %s1018_s17 }
  0x3e   : > { %s25_s10 = ssub.s32 %s1022_s18, %s1173_s26  ;;  %p35_p13 = scmp.ne.s32.totalorder %s1018_s17, %s1014_s16 }
  0x3f   : > { %p26_p6 = scmp.eq.s32.totalorder %s25_s10, 0  ;;  %p36_p10 = scmp.eq.s32.totalorder %s1022_s18, 0 }
  0x40   : > { %p1329_p3 = scmp.eq.s32.totalorder %s1078_s19, 1  ;;  %p816_p7 = scmp.lt.s32.totalorder %s1022_s18, 2 }
  0x41   : > { %s1189_s14 = scalar_select %p26_p6, %s1018_s17, %s28_s9  }
  0x42   : > { %p1183_p5 = por %p1329_p3, %p35_p13  ;;  %p37_p9 = por %p36_p10, %p35_p13 }
  0x43   : > { %s183_s20 = sand.u32 1, %s1018_s17   ;;  %s670_s28 = sshll.u32 %s1022_s18, 8 }
  0x44   : > { %s1330_s13 = scalar_select %p1183_p5, 1, 0 }
  0x45   : > { %s654_s24 = sshll.u32 %s183_s20, 4  ;;  %s1196_s30 = scalar_lea.hbm %s1317_s0, %s670_s28 }
  0x46   : > { %s187_s5 = scalar_lea.vmem [#allocation2], %s654_s24  ;;  %p1200_p11 = pnand %p816_p7, %p37_p9 }
  0x47   : > { %s194_s6 = sshll.u32 %s187_s5, 4  ;;  %s1204_s7 = scalar_lea.sflag [#allocation3], %s183_s20  ;;  %s1198_s6 = int_to_ptr.vmem [resolvable:$true] %s194_s6 }
  0x48   : > { %s922_s8 = scalar_lea.hbm %s1196_s30, 256  ;;  %p924_p0 = pneg %p1200_p11 }
  0x49   : > { %p923_p12 = scmp.ne.s32.totalorder %s1196_s30, %s922_s8  ;;  %s927_s24 = scalar_lea.hbm %s1317_s0, 512 }
  0x4a   : > { %p928_p13 = scmp.lt.u32.totalorder %s1196_s30, %s1317_s0  ;;  %p929_p6 = scmp.lt.u32.totalorder %s927_s24, %s922_s8 }
  0x4b   : > { %p925_p1 = pnand %p924_p0, %p923_p12  ;;  %p931_p3 = scmp.lt.u32.totalorder %s922_s8, %s1196_s30 }
  0x4c   : > { %p930_p10 = por %p929_p6, %p928_p13 }
  0x4d   : > { %p926_p2 = pneg %p925_p1 }
  0x4e   : > { %p932_p7 = por %p931_p3, %p930_p10 }
  0x50   : > { %p933_p9 = pnand %p932_p7, %p926_p2 }
  0x52   : > { %936 = shalt.err (!%p933_p9)
}
  0x53   : > { %s937_s20 = scalar_lea.vmem %s1198_s6, 256  ;;  %s1028_s29 = smov [#allocation2]  }
  0x54   : > { %p938_p12 = scmp.ne.s32.totalorder %s1198_s6, %s937_s20  ;;  %s942_s5 = sshll.u32 %s1028_s29, 4  ;;  %s943_s5 = int_to_ptr.vmem [resolvable:$false] %s942_s5 }
  0x55   : > { %s944_s9 = scalar_lea.vmem %s943_s5, 512  ;;  %p945_p4 = scmp.lt.s32.totalorder %s1198_s6, %s943_s5 }
  0x56   : > { %p940_p1 = pnand %p938_p12, %p924_p0  ;;  %p946_p13 = scmp.lt.s32.totalorder %s944_s9, %s937_s20 }
  0x58   : > { %p941_p5 = pneg %p940_p1  ;;  %p947_p6 = por %p946_p13, %p945_p4 }
  0x5a   : > { %p948_p10 = pnand %p947_p6, %p941_p5 }
  0x5c   : > { %951 = shalt.err (!%p948_p10)
}
  0x5d   : > { %809 = dma.hbm_to_vmem [thread:$0]  (!%p1200_p11), %s1196_s30, 256, %s1198_s6, %s1204_s7, %s1026_s11, %s1026_s11, %s1027_s12  }
  0x5e   : > { %206 = sbr.rel (%p1097_p8) target bundleno = 974 (0x3ce), region = 36  ;;  %s1238_s8 = sand.u32 (!%p1097_p8), 1, %s1014_s16  }
  0x5f   : > { %s658_s10 = sshll.u32 (!%p1097_p8), %s1238_s8, 4  ;;  %s209_s24 = scalar_lea.sflag (!%p1097_p8), [#allocation3], %s1238_s8 }
  0x60   : > { %s1244_s25 = scalar_lea.vmem (!%p1097_p8), [#allocation2], %s658_s10  ;;  %p1332_p4 = scmp.ne.s32.totalorder (!%p1097_p8), %s1325_s21, 0 }
  0x65   : > { %997 = dma.done.wait (%p1332_p4), %s209_s24, 256  }
  0x66   : > { %999 = vsyncadd (%p1332_p4), %s209_s24, 4294967040  ;;  %p1333_p5 = scmp.eq.s32.totalorder %s1078_s19, 0 }
  0x68   : > { %1001 = dma.done.wait (%p1333_p5), [#allocation6], 2304   ;;  %p1334_p8 = pmov %p1333_p5 }
  0x69   : > { %v251_v0 = vld [vmem:[#allocation5] sm:$0xff]  ;;  %v252_v1 = vld [vmem:[#allocation5 + $0x8] sm:$0xff]  ;;  %v253_v2 = vld [vmem:[#allocation5 + $0x10] sm:$0xff]  ;;  %vm423_vm0 = vcmask 130048   ;;  %s244_s21 = scalar_lea.vmem [#allocation8], %s658_s10  ;;  %s671_s30 = sshll.u32 %s1078_s19, 8 }
  0x6a   : > { %1003 = vsyncadd (%p1334_p8), [#allocation6], 4294964992  ;;  %v747_v3 = vpack.c.bf16 %v252_v1, %v251_v0  ;;  %v254_v4 = vld [vmem:[#allocation5 + $0x18] sm:$0xff]  ;;  %v255_v6 = vld [vmem:[#allocation5 + $0x20] sm:$0xff]  ;;  %s557_s23 = sshll.u32 %s244_s21, 4  ;;  %s1273_s28 = scalar_lea.hbm %s1321_s4, %s671_s30  ;;  %s1268_s23 = int_to_ptr.vmem [resolvable:$true] %s557_s23 }
  0x6b   : > { %v751_v5 = vpack.c.bf16 %v254_v4, %v253_v2  ;;  %v256_v7 = vld [vmem:[#allocation5 + $0x28] sm:$0xff]  ;;  %v249_v9 = vld [vmem:[%s1244_s25] sm:$0xff]  ;;  %v258_v11 = vld [vmem:[#allocation5 + $0x38] sm:$0xff]  ;;  %s544_s27 = scalar_lea.sflag [#allocation4], %s1238_s8  ;;  %s952_s20 = scalar_lea.vmem %s1268_s23, 256 }
  0x6c   : > { %748 = vmatprep.subr.bf16.mxu0 %v747_v3  ;;  %v755_v8 = vpack.c.bf16 %v256_v7, %v255_v6  ;;  %v257_v10 = vld [vmem:[#allocation5 + $0x30] sm:$0xff]  ;;  %730 = vmatprep.mubr.f32.mxu0 %v249_v9  ;;  %v259_v13 = vld [vmem:[#allocation5 + $0x40] sm:$0xff]  ;;  %v260_v14 = vld [vmem:[#allocation5 + $0x48] sm:$0xff]  ;;  %p953_p11 = scmp.ne.s32.totalorder %s1268_s23, %s952_s20  ;;  %p1335_p0 = scmp.ne.s32.totalorder %s1330_s13, 0 }
  0x6d   : > { %750 = vmatpush3.bf16.msra.mxu0 %v747_v3  ;;  %v759_v12 = vpack.c.bf16 %v258_v11, %v257_v10  ;;  %v763_v15 = vpack.c.bf16 %v260_v14, %v259_v13  ;;  %v261_v16 = vld [vmem:[#allocation5 + $0x50] sm:$0xff]  ;;  %v262_v17 = vld [vmem:[#allocation5 + $0x58] sm:$0xff]  ;;  %v263_v19 = vld [vmem:[#allocation5 + $0x60] sm:$0xff]  ;;  %s1029_s19 = smov [#allocation8]  }
  0x6e   : > { %752 = vmatprep.subr.bf16.mxu0 %v751_v5  ;;  %v767_v18 = vpack.c.bf16 %v262_v17, %v261_v16  ;;  %v264_v20 = vld [vmem:[#allocation5 + $0x68] sm:$0xff]  ;;  %v265_v22 = vld [vmem:[#allocation5 + $0x70] sm:$0xff]  ;;  %v266_v23 = vld [vmem:[#allocation5 + $0x78] sm:$0xff]  ;;  %p954_p2 = pnand %p953_p11, %p1335_p0  ;;  %s956_s29 = sshll.u32 %s1029_s19, 4  ;;  %s957_s29 = int_to_ptr.vmem [resolvable:$false] %s956_s29 }
  0x6f   : > { %v771_v21 = vpack.c.bf16 %v264_v20, %v263_v19  ;;  %v775_v24 = vpack.c.bf16 %v266_v23, %v265_v22  ;;  %v250_v25 = vld [vmem:[%s1244_s25 + $0x8] sm:$0xff]  ;;  %v246_v30 = vld [vmem:[#allocation7] sm:$0xff]  ;;  %s958_s5 = scalar_lea.vmem %s957_s29, 512  ;;  %p959_p7 = scmp.lt.s32.totalorder %s1268_s23, %s957_s29 }
  0x70   : > { %v247_v29 = vld [vmem:[#allocation7 + $0x8] sm:$0xff]  ;;  %v664_v58 = vld [vmem:[%s1320_s3] ss:$0 sm:$0xff]  ;;  %p955_p3 = pneg %p954_p2  ;;  %p960_p9 = scmp.lt.s32.totalorder %s958_s5, %s952_s20 }
  0x71   : > { %754 = vmatpush3.bf16.msra.mxu0 %v751_v5 }
  0x72   : > { %756 = vmatprep.subr.bf16.mxu0 %v755_v8  ;;  %p961_p12 = por %p960_p9, %p959_p7 }
  0x74   : > { %p962_p1 = pnand %p961_p12, %p955_p3 }
  0x75   : > { %758 = vmatpush3.bf16.msra.mxu0 %v755_v8 }
  0x76   : > { %760 = vmatprep.subr.bf16.mxu0 %v759_v12 }
  0x79   : > { %762 = vmatpush3.bf16.msra.mxu0 %v759_v12 }
  0x7a   : > { %764 = vmatprep.subr.bf16.mxu0 %v763_v15 }
  0x7d   : > { %766 = vmatpush3.bf16.msra.mxu0 %v763_v15 }
  0x7e   : > { %768 = vmatprep.subr.bf16.mxu0 %v767_v18 }
  0x81   : > { %770 = vmatpush3.bf16.msra.mxu0 %v767_v18 }
  0x82   : > { %772 = vmatprep.subr.bf16.mxu0 %v771_v21 }
  0x85   : > { %774 = vmatpush3.bf16.msra.mxu0 %v771_v21 }
  0x86   : > { %776 = vmatprep.subr.bf16.mxu0 %v775_v24 }
  0x89   : > { %778 = vmatpush3.bf16.msra.mxu0 %v775_v24 }
  0x8c   : > { %731 = vmatmul.mubr.f32.vlgmr.msra.gmra.mrb[0].mxu0 %v250_v25 }
 0x15f   : > { %v732_v26 = vpop.f32.mrb[0].mxu0 }
 0x160   : > { %v333_v27 = vpop.f32.mrb[1].mxu0 }
 0x161   : > { %v779_v28 = vpack.c.bf16 %v732_v26, %v333_v27  ;;  %737 = vmatprep.mubr.f32.mxu1 %v333_v27 }
 0x163   : > { %780 = vmatprep.subr.bf16.mxu1 %v779_v28 }
 0x164   : > { %782 = vmatpush3.bf16.xpose.msra.mxu1 %v779_v28 }
 0x165   : > { %784 = vmatprep.subr.bf16.mxu1 %v779_v28 }
 0x16b   : > { %738 = vmatmul.mubr.f32.vlgmr.msra.gmra.mrb[0].mxu1 %v732_v26 }
 0x16c   : > { %786 = vmatpush3.bf16.msra.mxu1 %v779_v28 }
 0x23e   : > { %v739_v31 = vpop.f32.mrb[0].mxu1 }
 0x23f   : > { %v418_v32 = vmul.f32 %v739_v31, %v247_v29  ;;  %v408_v33 = vpop.f32.mrb[1].mxu1 }
 0x240   : > { %v417_v34 = vmul.f32 %v408_v33, %v246_v30 }
 0x241   : > { %vm420_vm2 = vcmp.eq.f32.partialorder %v418_v32, 0.0 }
 0x242   : > { %vm419_vm1 = vcmp.eq.f32.partialorder %v417_v34, 0.0  ;;  %v422_v37 = vsel %vm420_vm2, -1e+16, %v418_v32 }
 0x243   : > { %v421_v35 = vsel %vm419_vm1, -1e+16, %v417_v34  ;;  %v427_v38 = vsel %vm423_vm0, %v422_v37, -inf }
 0x244   : > { %v424_v36 = vsel %vm423_vm0, %v421_v35, -inf }
 0x245   : > { %425 = vmax.xlane.f32.xlu0 %v424_v36 }
 0x249   : > { %428 = vmax.xlane.f32.xlu0 %v427_v38 }
 0x2d2   : > { %v426_v39 = vpop.xlane.xlu0 %425 }
 0x2d3   : > { %v430_v40 = vsub.f32 %v421_v35, %v426_v39 }
 0x2d5   : > { %v432_v41 = vmul.f32 1.442695, %v430_v40 }
 0x2d6   : > { %v429_v42 = vpop.xlane.xlu0 %428 }
 0x2d7   : > { %858 = vpow2.f32 %v432_v41  ;;  %v431_v43 = vsub.f32 %v422_v37, %v429_v42 }
 0x2d9   : > { %v434_v44 = vmul.f32 1.442695, %v431_v43 }
 0x2db   : > { %860 = vpow2.f32 %v434_v44 }
 0x2e1   : > { %v859_v45 = vpop.eup %858 }
 0x2e2   : > { %744 = vmatprep.mubr.msk.f32.mxu1 %vm423_vm0, %v859_v45  ;;  %v436_v46 = vsel %vm423_vm0, %v859_v45, 0.0 }
 0x2e3   : > { %437 = vadd.xlane.f32.xlu1 %v436_v46 }
 0x2e5   : > { %v861_v47 = vpop.eup %860 }
 0x2e6   : > { %745 = vmatmul.mubr.msk.f32.vlgmr.msra.gmra.mrb[2].mxu1 %vm423_vm0, %v861_v47  ;;  %v439_v48 = vsel %vm423_vm0, %v861_v47, 0.0 }
 0x2e7   : > { %440 = vadd.xlane.f32.xlu1 %v439_v48 }
 0x370   : > { %v438_v49 = vpop.xlane.xlu1 %437 }
 0x374   : > { %v441_v50 = vpop.xlane.xlu1 %440 }
 0x375   : > { %862 = vrcp.f32 %v441_v50 }
 0x376   : > { %864 = vrcp.f32 %v438_v49 }
 0x37f   : > { %v863_v51 = vpop.eup %862 }
 0x380   : > { %v865_v52 = vpop.eup %864  ;;  %v526_v53 = vmul.f32 %v863_v51, %v441_v50 }
 0x381   : > { %v525_v54 = vmul.f32 %v865_v52, %v438_v49 }
 0x382   : > { %v528_v55 = vsub.f32 2.0, %v526_v53 }
 0x383   : > { %v527_v56 = vsub.f32 2.0, %v525_v54 }
 0x384   : > { %v530_v57 = vmul.f32 %v863_v51, %v528_v55 }
 0x385   : > { %v529_v60 = vmul.f32 %v865_v52, %v527_v56 }
 0x3b9   : > { %v746_v59 = vpop.f32.mrb[2].mxu1 }
 0x3ba   : > { %v532_v61 = vmul.f32 %v746_v59, %v530_v57  ;;  %v514_v62 = vpop.f32.mrb[3].mxu1 }
 0x3bb   : > { %v531_v63 = vmul.f32 %v529_v60, %v514_v62 }
 0x3bc   : > { %v540_v0 = vadd.f32 %v664_v58, %v532_v61 }
 0x3bd   : > { %v539_v1 = vadd.f32 %v664_v58, %v531_v63 }
 0x3be   : > { %542 = vst [vmem:[%s244_s21 + $0x8] sm:$0xff] %v540_v0 }
 0x3bf   : > { %541 = vst [vmem:[%s244_s21] sm:$0xff] %v539_v1 }
 0x3c0   : > { %965 = shalt.err (!%p962_p1)
}
 0x3c1   : > { %s966_s9 = scalar_lea.hbm %s1273_s28, 256  ;;  %s970_s25 = scalar_lea.hbm %s1321_s4, 512 }
 0x3c2   : > { %p967_p13 = scmp.ne.s32.totalorder %s1273_s28, %s966_s9  ;;  %p971_p4 = scmp.lt.u32.totalorder %s1273_s28, %s1321_s4 }
 0x3c3   : > { %p972_p5 = scmp.lt.u32.totalorder %s970_s25, %s966_s9  ;;  %p974_p11 = scmp.lt.u32.totalorder %s966_s9, %s1273_s28 }
 0x3c4   : > { %p968_p6 = pnand %p967_p13, %p1335_p0 }
 0x3c5   : > { %p973_p8 = por %p972_p5, %p971_p4 }
 0x3c6   : > { %p969_p10 = pneg %p968_p6 }
 0x3c7   : > { %p975_p2 = por %p974_p11, %p973_p8 }
 0x3c9   : > { %p976_p3 = pnand %p975_p2, %p969_p10 }
 0x3cb   : > { %979 = shalt.err (!%p976_p3)
}
 0x3cc   : > { %s1030_s12 = smov 128   ;;  %s1031_s30 = smov 8  }
 0x3cd   : > { %797 = dma.vmem_to_hbm [thread:$0]  (%p1335_p0), %s1268_s23, 256, %s1273_s28, %s544_s27, %s1030_s12, %s1030_s12, %s1031_s30  }
 0x3ce PF: > { %s572_s6 = sand.u32 1, %s1010_s15   ;;  %p1336_p7 = scmp.ne.s32.totalorder %s1326_s22, 0 }
 0x3cf   : > { %p1337_p9 = scmp.ge.s32.totalorder %s1022_s18, 2  ;;  %s573_s7 = scalar_lea.sflag [#allocation4], %s572_s6 }
 0x3d1   : > { %p811_p12 = pnand %p1337_p9, %p1336_p7 }
 0x3d3   : > { %1005 = dma.done.wait (!%p811_p12), %s573_s7, 256  }
 0x3d4   : > { %1007 = vsyncadd (!%p811_p12), %s573_s7, 4294967040  ;;  %p18_p1 = scmp.ge.s32.totalorder %s1173_s26, 4   ;;  %s1338_s15 = smov %s1014_s16 }
 0x3d5   : > { %s1339_s16 = smov %s1018_s17  ;;  %s1340_s17 = smov %s1189_s14 }
 0x3d6   : > { %s1341_s18 = smov %s1173_s26  ;;  %20 = sbr.rel (!%p18_p1) target bundleno = 6 (0x6), region = 89 }
 0x3dd   :  { %578 = vsyncpa [#allocation3], 1 }
 0x3de   :  { %580 = vsyncpa [#allocation3 + $0x1], 1 }
 0x3df   :  { %581 = vsyncpa [#allocation6], 1 }
 0x3e0   :  { %582 = vsyncpa [#allocation4], 1 }
 0x3e1   :  { %584 = vsyncpa [#allocation4 + $0x1], 1 }

</bundles_post_ra>
